<compile_context>
chip_gen: v7x
topology: tpu7x:2x2x1
jax: 0.10.0
libtpu: 0.0.40
codegen_flags: <defaults>
</compile_context>

<pallas_src>
import jax
import jax.numpy as jnp
import numpy as np
from jax.experimental import pallas as pl
from jax.experimental.pallas import tpu as pltpu

BN_EPS = 1e-5
_LANE = 128


def _round_up(x, m):
    return ((x + m - 1) // m) * m


# ----------------------------------------------------------------------------
# Kernel bodies
# ----------------------------------------------------------------------------
def _bn_relu_store(y, bn_ref, o_ref):
    """Training-mode BatchNorm1d (+ affine) followed by ReLU, stored to o_ref."""
    n = y.shape[0]
    inv_n = 1.0 / n
    mean = jnp.sum(y, axis=0, keepdims=True) * inv_n
    diff = y - mean
    var = jnp.sum(diff * diff, axis=0, keepdims=True) * inv_n
    y_hat = diff * jax.lax.rsqrt(var + BN_EPS)
    gamma = bn_ref[0:1, :]
    beta = bn_ref[1:2, :]
    o_ref[...] = jnp.maximum(y_hat * gamma + beta, 0.0).astype(o_ref.dtype)


def _single_shot_kernel(x_hbm, w1_ref, b1_ref, w2_ref, bn_ref, o_ref,
                        x_vmem, sem):
    # x stays in HBM (memory_space=pl.ANY); copy it once into a *single*
    # VMEM buffer (no double-buffering of the dominant operand).
    cp = pltpu.make_async_copy(x_hbm, x_vmem, sem)
    cp.start()
    cp.wait()

    # fc_1 + ReLU: one MXU pass over the full fc_size contraction.
    h = jnp.dot(x_vmem[...], w1_ref[...], preferred_element_type=jnp.float32)
    h = jnp.maximum(h + b1_ref[...], 0.0)

    # fc_2 (b2 omitted: cancelled by the BN mean subtraction).
    y = jnp.dot(h, w2_ref[...], preferred_element_type=jnp.float32)

    _bn_relu_store(y, bn_ref, o_ref)


def _ktiled_kernel(x_ref, w1_ref, b1_ref, w2_ref, bn_ref, o_ref, acc_ref):
    # Fallback for large N*F: tile only the contraction (F) axis so BN stats
    # over the full batch stay exact.
    k = pl.program_id(0)

    @pl.when(k == 0)
    def _():
        acc_ref[...] = jnp.zeros_like(acc_ref)

    acc_ref[...] += jnp.dot(x_ref[...], w1_ref[...],
                            preferred_element_type=jnp.float32)

    @pl.when(k == pl.num_programs(0) - 1)
    def _():
        h = jnp.maximum(acc_ref[...] + b1_ref[...], 0.0)
        y = jnp.dot(h, w2_ref[...], preferred_element_type=jnp.float32)
        _bn_relu_store(y, bn_ref, o_ref)


# ----------------------------------------------------------------------------
# Parameter prep (do ONCE at init, not per forward call)
# ----------------------------------------------------------------------------
def prepare_params(w1, b1, w2, b2, gamma, beta_bn, *, matmul_dtype=jnp.float32):
    """Pad/pack parameters to lane-dense tiles once.

    w1: (F, 100), b1: (100,) or (1,100), w2: (100, 2), gamma/beta_bn: (2,) or
    (1,2).  b2 is accepted for API parity but is cancelled by training-mode BN.
    matmul_dtype: dtype of the fc1 matmul operands; the caller must supply x in
    the same dtype (no per-call cast is performed in the forward wrapper).
    """
    del b2  # provably a no-op through training-mode BatchNorm (batch stats)
    F, H = w1.shape
    C = w2.shape[1]
    HP = _round_up(H, _LANE)   # 100 -> 128
    CP = _round_up(C, _LANE)   # 2   -> 128
    w1p = jnp.pad(jnp.asarray(w1, jnp.float32),
                  ((0, 0), (0, HP - H))).astype(matmul_dtype)
    b1p = jnp.pad(jnp.asarray(b1, jnp.float32).reshape(1, -1),
                  ((0, 0), (0, HP - H)))
    w2p = jnp.pad(jnp.asarray(w2, jnp.float32),
                  ((0, HP - H), (0, CP - C)))
    g = jnp.pad(jnp.asarray(gamma, jnp.float32).reshape(1, -1),
                ((0, 0), (0, CP - C)))
    b = jnp.pad(jnp.asarray(beta_bn, jnp.float32).reshape(1, -1),
                ((0, 0), (0, CP - C)))
    bn = jnp.concatenate([g, b], axis=0)           # (2, CP) single operand
    return {"w1": w1p, "b1": b1p, "w2": w2p, "bn": bn}


# ----------------------------------------------------------------------------
# Forward wrapper
# ----------------------------------------------------------------------------
def d_cls_inst_forward(x, params, *, num_classes=2,
                       vmem_budget_bytes=64 * 1024 * 1024):
    """x: (N, F) in the dtype chosen at prepare_params() time. Returns (N, 2) f32.

    Do NOT cast f32 x to bf16 right before this call — that doubles rather than
    halves HBM traffic on x; only use bf16 when the producer emits it directly.
    """
    w1p, b1p, w2p, bn = params["w1"], params["b1"], params["w2"], params["bn"]
    N, F = x.shape
    if N < 2:
        # PyTorch BatchNorm1d (training) rejects N==1; keep the same contract.
        raise ValueError("d_cls_inst_forward requires batch size >= 2.")
    assert w1p.shape[0] == F, "x feature dim must match prepared w1"
    HP = w1p.shape[1]
    CP = w2p.shape[1]

    xi = jnp.dtype(x.dtype).itemsize
    wi = jnp.dtype(w1p.dtype).itemsize

    def single_need():
        return (N * F * xi                 # x: single-buffered VMEM scratch
                + 2 * (F * HP * wi)        # W1 (pipeline double buffer)
                + 2 * (HP * CP * 4)        # W2
                + 2 * (N * CP * 4)         # output
                + 2 * (N * HP * 4)         # h / BN temporaries
                + (2 << 20))               # misc headroom

    def ktiled_need(tk):
        return (2 * (N * tk * xi)          # x tile (double buffered)
                + 2 * (tk * HP * wi)       # W1 tile
                + 2 * (HP * CP * 4)
                + 2 * (N * CP * 4)
                + 2 * (N * HP * 4)         # accumulator + epilogue temporaries
                + (2 << 20))

    sneed = single_need()
    tk = None
    if sneed > vmem_budget_bytes:
        for cand in (2048, 1024, 512, 256, 128):
            if F % cand == 0 and ktiled_need(cand) <= vmem_budget_bytes:
                tk = cand
                break
        # TODO(synk): pad F at prepare_params time so the K-tiled fallback can
        # also handle fc_size values that are not multiples of 128.

    if tk is None:
        # --- Single-shot path: whole problem resident in VMEM, grid=(1,). ---
        need = sneed
        vmem_limit = int(min(max(need + need // 4, 32 << 20), 128 << 20))
        kernel = pl.pallas_call(
            _single_shot_kernel,
            out_shape=jax.ShapeDtypeStruct((N, CP), jnp.float32),
            grid_spec=pltpu.PrefetchScalarGridSpec(
                num_scalar_prefetch=0,
                grid=(1,),
                in_specs=[
                    pl.BlockSpec(memory_space=pl.ANY),          # x stays in HBM
                    pl.BlockSpec((F, HP), lambda i: (0, 0)),    # W1 (padded)
                    pl.BlockSpec((1, HP), lambda i: (0, 0)),    # b1
                    pl.BlockSpec((HP, CP), lambda i: (0, 0)),   # W2 (padded)
                    pl.BlockSpec((2, CP), lambda i: (0, 0)),    # [gamma; beta]
                ],
                out_specs=pl.BlockSpec((N, CP), lambda i: (0, 0)),
                scratch_shapes=[
                    pltpu.VMEM((N, F), x.dtype),                # single-buffered x
                    pltpu.SemaphoreType.DMA(()),
                ],
            ),
            compiler_params=pltpu.CompilerParams(
                dimension_semantics=("arbitrary",),
                vmem_limit_bytes=vmem_limit),
        )
        out_padded = kernel(x, w1p, b1p, w2p, bn)
    else:
        # --- K-tiled fallback for large N*F (v7x's 64 MiB VMEM in mind). ---
        need = ktiled_need(tk)
        vmem_limit = int(min(max(need + need // 4, 32 << 20), 128 << 20))
        kernel = pl.pallas_call(
            _ktiled_kernel,
            out_shape=jax.ShapeDtypeStruct((N, CP), jnp.float32),
            grid_spec=pltpu.PrefetchScalarGridSpec(
                num_scalar_prefetch=0,
                grid=(F // tk,),
                in_specs=[
                    pl.BlockSpec((N, tk), lambda k: (0, k)),    # x K-tile
                    pl.BlockSpec((tk, HP), lambda k: (k, 0)),   # W1 K-tile
                    pl.BlockSpec((1, HP), lambda k: (0, 0)),    # b1
                    pl.BlockSpec((HP, CP), lambda k: (0, 0)),   # W2
                    pl.BlockSpec((2, CP), lambda k: (0, 0)),    # [gamma; beta]
                ],
                out_specs=pl.BlockSpec((N, CP), lambda k: (0, 0)),
                scratch_shapes=[pltpu.VMEM((N, HP), jnp.float32)],
            ),
            compiler_params=pltpu.CompilerParams(
                dimension_semantics=("arbitrary",),
                vmem_limit_bytes=vmem_limit),
        )
        out_padded = kernel(x, w1p, b1p, w2p, bn)

    # TODO(synk): for very large N, emit a lane-dense (num_classes, N) output
    # in-kernel (XLU transpose of the 2 live columns) instead of this slice.
    return out_padded[:, :num_classes]


# ----------------------------------------------------------------------------
# Pure-JAX reference (mirrors the PyTorch module in training mode)
# ----------------------------------------------------------------------------
def reference_forward(x, w1, b1, w2, b2, gamma, beta_bn):
    h = jnp.maximum(x @ w1 + b1, 0.0)
    y = h @ w2 + b2
    mean = jnp.mean(y, axis=0, keepdims=True)
    var = jnp.mean((y - mean) ** 2, axis=0, keepdims=True)
    y = (y - mean) / jnp.sqrt(var + BN_EPS) * gamma + beta_bn
    return jnp.maximum(y, 0.0)


if __name__ == "__main__":
    # Small, deterministic config (fc_size shrunk from the module default 2048).
    N = 8          # batch
    FC_SIZE = 256  # in_features of fc_1_inst
    HIDDEN = 100   # out_features of fc_1_inst (fixed by the module)
    OUT = 2        # out_features of fc_2_inst (fixed by the module)

    key = jax.random.PRNGKey(0)
    kx, kw1, kb1, kw2, kb2 = jax.random.split(key, 5)

    x = jax.random.normal(kx, (N, FC_SIZE), dtype=jnp.float32)

    lim1 = 1.0 / np.sqrt(FC_SIZE)
    w1 = jax.random.uniform(kw1, (FC_SIZE, HIDDEN), jnp.float32, -lim1, lim1)
    b1 = jax.random.uniform(kb1, (1, HIDDEN), jnp.float32, -lim1, lim1)
    lim2 = 1.0 / np.sqrt(HIDDEN)
    w2 = jax.random.uniform(kw2, (HIDDEN, OUT), jnp.float32, -lim2, lim2)
    b2 = jax.random.uniform(kb2, (1, OUT), jnp.float32, -lim2, lim2)

    # BatchNorm1d(2) affine params at PyTorch defaults: weight=1, bias=0.
    gamma = jnp.ones((1, OUT), jnp.float32)
    beta_bn = jnp.zeros((1, OUT), jnp.float32)

    ref = reference_forward(x, w1, b1, w2, b2, gamma, beta_bn)

    fwd = jax.jit(d_cls_inst_forward,
                  static_argnames=("num_classes", "vmem_budget_bytes"))

    # f32 path (exact-fidelity default). Params packed once, reused per call.
    params_f32 = prepare_params(w1, b1, w2, b2, gamma, beta_bn)
    out = jax.block_until_ready(fwd(x, params_f32))
    np.testing.assert_allclose(np.asarray(out), np.asarray(ref),
                               rtol=1e-4, atol=1e-4)

    # bf16 matmul path: x arrives already in bf16 from its producer (the cast
    # below stands in for that producer; it is NOT part of the forward path).
    params_bf16 = prepare_params(w1, b1, w2, b2, gamma, beta_bn,
                                 matmul_dtype=jnp.bfloat16)
    x_bf16 = x.astype(jnp.bfloat16)
    out_bf16 = jax.block_until_ready(fwd(x_bf16, params_bf16))
    np.testing.assert_allclose(np.asarray(out_bf16), np.asarray(ref),
                               rtol=1e-1, atol=1e-1)

    print("KERNEL_OK")
</pallas_src>

<mosaic_0001>
module attributes {stable_mosaic.version = 11 : i64} {
  func.func @_single_shot_kernel(%arg0: i32, %arg1: memref<8x256xf32, #tpu.memory_space<any>>, %arg2: memref<256x128xf32, #tpu.memory_space<vmem>>, %arg3: memref<1x128xf32, #tpu.memory_space<vmem>>, %arg4: memref<128x128xf32, #tpu.memory_space<vmem>>, %arg5: memref<2x128xf32, #tpu.memory_space<vmem>>, %arg6: memref<8x128xf32, #tpu.memory_space<vmem>>, %arg7: memref<8x256xf32, #tpu.memory_space<vmem>>, %arg8: memref<!tpu.dma_semaphore, #tpu.memory_space<semaphore_mem>>) attributes {dimension_semantics = [#tpu.dimension_semantics<arbitrary>], iteration_bounds = array<i64: 1>, scalar_prefetch = 0 : i64, scratch_operands = 2 : i64, tpu.core_type = #tpu.core_type<tc>, window_params = [{}, {pipeline_mode = #tpu.pipeline_mode<synchronous>, transform_indices = @transform_1, window_bounds = array<i64: 256, 128>}, {pipeline_mode = #tpu.pipeline_mode<synchronous>, transform_indices = @transform_2, window_bounds = array<i64: 1, 128>}, {pipeline_mode = #tpu.pipeline_mode<synchronous>, transform_indices = @transform_3, window_bounds = array<i64: 128, 128>}, {pipeline_mode = #tpu.pipeline_mode<synchronous>, transform_indices = @transform_4, window_bounds = array<i64: 2, 128>}, {pipeline_mode = #tpu.pipeline_mode<synchronous>, transform_indices = @transform_5, window_bounds = array<i64: 8, 128>}]} {
    tpu.enqueue_dma source(%arg1 : memref<8x256xf32, #tpu.memory_space<any>>) target(%arg7 : memref<8x256xf32, #tpu.memory_space<vmem>>) target_semaphore(%arg8 : memref<!tpu.dma_semaphore, #tpu.memory_space<semaphore_mem>>)
    tpu.wait_dma2 semaphore(%arg8 : memref<!tpu.dma_semaphore, #tpu.memory_space<semaphore_mem>>) src(%arg1 : memref<8x256xf32, #tpu.memory_space<any>>) dst(%arg7 : memref<8x256xf32, #tpu.memory_space<vmem>>)
    %c0 = arith.constant 0 : index
    %c0_0 = arith.constant 0 : index
    %0 = vector.load %arg7[%c0, %c0_0] : memref<8x256xf32, #tpu.memory_space<vmem>>, vector<8x256xf32>
    %c0_1 = arith.constant 0 : index
    %c0_2 = arith.constant 0 : index
    %1 = vector.load %arg2[%c0_1, %c0_2] : memref<256x128xf32, #tpu.memory_space<vmem>>, vector<256x128xf32>
    %cst = arith.constant dense<0.000000e+00> : vector<8x128xf32>
    %2 = tpu.matmul %0, %1, %cst {dimension_numbers = #tpu.dot_dimension_numbers<[1], [0], [0], [1], [0, 0, 1, 1], [], []>} : vector<8x256xf32>, vector<256x128xf32>, vector<8x128xf32> -> vector<8x128xf32>
    %c0_3 = arith.constant 0 : index
    %c0_4 = arith.constant 0 : index
    %3 = vector.load %arg3[%c0_3, %c0_4] : memref<1x128xf32, #tpu.memory_space<vmem>>, vector<1x128xf32>
    %4 = vector.broadcast %3 : vector<1x128xf32> to vector<8x128xf32>
    %5 = arith.addf %2, %4 : vector<8x128xf32>
    %cst_5 = arith.constant 0.000000e+00 : f32
    %6 = vector.broadcast %cst_5 : f32 to vector<8x128xf32>
    %7 = arith.maximumf %5, %6 : vector<8x128xf32>
    %c0_6 = arith.constant 0 : index
    %c0_7 = arith.constant 0 : index
    %8 = vector.load %arg4[%c0_6, %c0_7] : memref<128x128xf32, #tpu.memory_space<vmem>>, vector<128x128xf32>
    %cst_8 = arith.constant dense<0.000000e+00> : vector<8x128xf32>
    %9 = tpu.matmul %7, %8, %cst_8 {dimension_numbers = #tpu.dot_dimension_numbers<[1], [0], [0], [1], [0, 0, 1, 1], [], []>} : vector<8x128xf32>, vector<128x128xf32>, vector<8x128xf32> -> vector<8x128xf32>
    %cst_9 = arith.constant dense<0.000000e+00> : vector<128xf32>
    %10 = vector.multi_reduction <add>, %9, %cst_9 [0] : vector<8x128xf32> to vector<128xf32>
    %11 = vector.shape_cast %10 : vector<128xf32> to vector<1x128xf32>
    %cst_10 = arith.constant 1.250000e-01 : f32
    %12 = vector.broadcast %cst_10 : f32 to vector<1x128xf32>
    %13 = arith.mulf %11, %12 : vector<1x128xf32>
    %14 = vector.broadcast %13 : vector<1x128xf32> to vector<8x128xf32>
    %15 = arith.subf %9, %14 : vector<8x128xf32>
    %16 = arith.mulf %15, %15 : vector<8x128xf32>
    %cst_11 = arith.constant dense<0.000000e+00> : vector<128xf32>
    %17 = vector.multi_reduction <add>, %16, %cst_11 [0] : vector<8x128xf32> to vector<128xf32>
    %18 = vector.shape_cast %17 : vector<128xf32> to vector<1x128xf32>
    %cst_12 = arith.constant 1.250000e-01 : f32
    %19 = vector.broadcast %cst_12 : f32 to vector<1x128xf32>
    %20 = arith.mulf %18, %19 : vector<1x128xf32>
    %cst_13 = arith.constant 9.99999974E-6 : f32
    %21 = vector.broadcast %cst_13 : f32 to vector<1x128xf32>
    %22 = arith.addf %20, %21 : vector<1x128xf32>
    %23 = math.rsqrt %22 : vector<1x128xf32>
    %24 = vector.broadcast %23 : vector<1x128xf32> to vector<8x128xf32>
    %25 = arith.mulf %15, %24 : vector<8x128xf32>
    %c0_14 = arith.constant 0 : index
    %c0_15 = arith.constant 0 : index
    %26 = vector.load %arg5[%c0_14, %c0_15] : memref<2x128xf32, #tpu.memory_space<vmem>>, vector<1x128xf32>
    %c1 = arith.constant 1 : index
    %c0_16 = arith.constant 0 : index
    %27 = vector.load %arg5[%c1, %c0_16] : memref<2x128xf32, #tpu.memory_space<vmem>>, vector<1x128xf32>
    %28 = vector.broadcast %26 : vector<1x128xf32> to vector<8x128xf32>
    %29 = arith.mulf %25, %28 : vector<8x128xf32>
    %30 = vector.broadcast %27 : vector<1x128xf32> to vector<8x128xf32>
    %31 = arith.addf %29, %30 : vector<8x128xf32>
    %cst_17 = arith.constant 0.000000e+00 : f32
    %32 = vector.broadcast %cst_17 : f32 to vector<8x128xf32>
    %33 = arith.maximumf %31, %32 : vector<8x128xf32>
    %c0_18 = arith.constant 0 : index
    %c0_19 = arith.constant 0 : index
    %34 = vector.load %arg6[%c0_18, %c0_19] : memref<8x128xf32, #tpu.memory_space<vmem>>, vector<8x128xf32>
    tpu.vector_store %arg6[%c0_18, %c0_19], %33 {strides = array<i32>} : memref<8x128xf32, #tpu.memory_space<vmem>>, vector<8x128xf32>,
    return
  }
  func.func @transform_1(%arg0: i32) -> (i32, i32) {
    %c0_i32 = arith.constant 0 : i32
    %c0_i32_0 = arith.constant 0 : i32
    %c0_i32_1 = arith.constant 0 : i32
    return %c0_i32, %c0_i32_0 : i32, i32
  }
  func.func @transform_2(%arg0: i32) -> (i32, i32) {
    %c0_i32 = arith.constant 0 : i32
    %c0_i32_0 = arith.constant 0 : i32
    %c0_i32_1 = arith.constant 0 : i32
    return %c0_i32, %c0_i32_0 : i32, i32
  }
  func.func @transform_3(%arg0: i32) -> (i32, i32) {
    %c0_i32 = arith.constant 0 : i32
    %c0_i32_0 = arith.constant 0 : i32
    %c0_i32_1 = arith.constant 0 : i32
    return %c0_i32, %c0_i32_0 : i32, i32
  }
  func.func @transform_4(%arg0: i32) -> (i32, i32) {
    %c0_i32 = arith.constant 0 : i32
    %c0_i32_0 = arith.constant 0 : i32
    %c0_i32_1 = arith.constant 0 : i32
    return %c0_i32, %c0_i32_0 : i32, i32
  }
  func.func @transform_5(%arg0: i32) -> (i32, i32) {
    %c0_i32 = arith.constant 0 : i32
    %c0_i32_0 = arith.constant 0 : i32
    %c0_i32_1 = arith.constant 0 : i32
    return %c0_i32, %c0_i32_0 : i32, i32
  }
}

</mosaic_0001>

<bundles_post_ra>
// kernel: d_cls_inst_forward.1
= control target key start
LH: loop header
LB: loop body
LE: loop exit
PB: predicated region body
PF: predicated region fallthrough
CT: control target
= control target key end

     0   :  { %10 = vsyncpa [#allocation5], 0  ;;  %s627_s0 = inlined_call_operand.hbm [shape: f32[8,256], index: 0, kind: input, shape index: {}]   ;;  %s628_s1 = inlined_call_operand.hbm [shape: f32[256,128], index: 1, kind: input, shape index: {}]   ;;  %s629_s2 = inlined_call_operand.vmem [shape: f32[1,128], index: 2, kind: input, shape index: {}]   ;;  %s630_s3 = inlined_call_operand.hbm [shape: f32[128,128], index: 3, kind: input, shape index: {}]   ;;  %s631_s4 = inlined_call_operand.vmem [shape: f32[2,128], index: 4, kind: input, shape index: {}]   ;;  %s632_s5 = inlined_call_operand.vmem [shape: f32[8,128], index: 5, kind: output, shape index: {}]  }
   0x1   :  { %11 = vsyncpa [#allocation7], 0  ;;  %s533_s18 = smov [#allocation4]   ;;  %s461_s22 = scalar_lea.hbm %s628_s1, 4096 }
   0x2   :  { %s17_s19 = sshll.u32 %s533_s18, 4  ;;  %p462_p0 = scmp.ne.s32.totalorder %s628_s1, %s461_s22  ;;  %s18_s19 = int_to_ptr.vmem [resolvable:$true] %s17_s19 }
   0x3   :  { %p465_p1 = scmp.lt.u32.totalorder %s461_s22, %s628_s1 }
   0x5   :  { %p467_p2 = pnand %p465_p1, %p462_p0 }
   0x7   :  { %470 = shalt.err (!%p467_p2)
}
   0x8   :  { %s471_s27 = scalar_lea.vmem %s18_s19, 4096  ;;  %p476_p4 = scmp.lt.s32.totalorder %s18_s19, %s18_s19 }
   0x9   :  { %p472_p3 = scmp.ne.s32.totalorder %s18_s19, %s471_s27  ;;  %p477_p5 = scmp.lt.s32.totalorder %s471_s27, %s471_s27 }
   0xb   :  { %p478_p6 = por %p477_p5, %p476_p4 }
   0xd   :  { %p479_p7 = pnand %p478_p6, %p472_p3 }
   0xf   :  { %482 = shalt.err (!%p479_p7)
}
  0x10   :  { %s534_s28 = smov 128   ;;  %s535_s29 = smov 8  }
  0x11   :  { %23 = dma.hbm_to_vmem [thread:$0]  %s628_s1, 4096, %s18_s19, [#allocation5], %s534_s28, %s534_s28, %s535_s29  }
  0x12   :  { %s536_s7 = smov [#allocation6]   ;;  %s483_s11 = scalar_lea.hbm %s630_s3, 2048 }
  0x13   :  { %s31_s8 = sshll.u32 %s536_s7, 4  ;;  %p484_p8 = scmp.ne.s32.totalorder %s630_s3, %s483_s11  ;;  %s32_s8 = int_to_ptr.vmem [resolvable:$true] %s31_s8 }
  0x14   :  { %p487_p9 = scmp.lt.u32.totalorder %s483_s11, %s630_s3 }
  0x16   :  { %p489_p10 = pnand %p487_p9, %p484_p8 }
  0x18   :  { %492 = shalt.err (!%p489_p10)
}
  0x19   :  { %s493_s16 = scalar_lea.vmem %s32_s8, 2048  ;;  %p498_p12 = scmp.lt.s32.totalorder %s32_s8, %s32_s8 }
  0x1a   :  { %p494_p11 = scmp.ne.s32.totalorder %s32_s8, %s493_s16  ;;  %p499_p13 = scmp.lt.s32.totalorder %s493_s16, %s493_s16 }
  0x1c   :  { %p500_p0 = por %p499_p13, %p498_p12 }
  0x1e   :  { %p501_p1 = pnand %p500_p0, %p494_p11 }
  0x20   :  { %504 = shalt.err (!%p501_p1)
}
  0x21   :  { %37 = dma.hbm_to_vmem [thread:$0]  %s630_s3, 2048, %s32_s8, [#allocation7], %s534_s28, %s534_s28, %s535_s29  }
  0x22   :  { %527 = dma.done.wait [#allocation5], 4096  }
  0x23   :  { %528 = vsyncadd [#allocation5], 4294963200 }
  0x24   :  { %529 = dma.done.wait [#allocation7], 2048  }
  0x25   :  { %530 = vsyncadd [#allocation7], 4294965248  ;;  %s537_s18 = smov [#allocation2]   ;;  %s505_s22 = scalar_lea.hbm %s627_s0, 256 }
  0x26   :  { %s53_s19 = sshll.u32 %s537_s18, 4  ;;  %p506_p2 = scmp.ne.s32.totalorder %s627_s0, %s505_s22  ;;  %s54_s19 = int_to_ptr.vmem [resolvable:$true] %s53_s19 }
  0x27   :  { %p509_p3 = scmp.lt.u32.totalorder %s505_s22, %s627_s0 }
  0x29   :  { %p511_p4 = pnand %p509_p3, %p506_p2 }
  0x2b   :  { %514 = shalt.err (!%p511_p4)  }
  0x2c   :  { %s515_s3 = scalar_lea.vmem %s54_s19, 256  ;;  %p520_p6 = scmp.lt.s32.totalorder %s54_s19, %s54_s19 }
  0x2d   :  { %p516_p5 = scmp.ne.s32.totalorder %s54_s19, %s515_s3  ;;  %p521_p7 = scmp.lt.s32.totalorder %s515_s3, %s515_s3 }
  0x2f   :  { %p522_p8 = por %p521_p7, %p520_p6 }
  0x31   :  { %p523_p9 = pnand %p522_p8, %p516_p5 }
  0x33   :  { %526 = shalt.err (!%p523_p9)  }
  0x34   :  { %56 = dma.hbm_to_vmem [thread:$0]  %s627_s0, 256, %s54_s19, [#allocation3] }
  0x35   :  { %531 = dma.done.wait [#allocation3], 256 }
  0x36   :  { %532 = vsyncadd [#allocation3], 4294967040  ;;  %v538_v0 = vmov 0.0|0.0   ;;  %v79_v1 = vld [vmem:[#allocation4 + $0x80] sm:$0xff]  ;;  %v80_v2 = vld [vmem:[#allocation4 + $0x88] sm:$0xff]  ;;  %vm539_vm0 = vmmov 0  }
  0x37   :  { %427 = vmatprep.subr.bf16.mxu1 %v538_v0  ;;  %v63_v3 = vld [vmem:[#allocation4] sm:$0xff]  ;;  %v395_v4 = vpack.c.bf16 %v80_v2, %v79_v1  ;;  %v64_v5 = vld [vmem:[#allocation4 + $0x8] sm:$0xff]  ;;  %v81_v6 = vld [vmem:[#allocation4 + $0x90] sm:$0xff] }
  0x38   :  { %v82_v7 = vld [vmem:[#allocation4 + $0x98] sm:$0xff]  ;;  %v397_v8 = vpack.c.bf16 %v64_v5, %v63_v3  ;;  %v65_v10 = vld [vmem:[#allocation4 + $0x10] sm:$0xff]  ;;  %v83_v12 = vld [vmem:[#allocation4 + $0xa0] sm:$0xff] }
  0x39   :  { %v399_v9 = vpack.c.bf16 %v82_v7, %v81_v6  ;;  %v66_v11 = vld [vmem:[#allocation4 + $0x18] sm:$0xff]  ;;  %396 = vmatprep.subr.bf16.mxu0 %v395_v4  ;;  %v84_v13 = vld [vmem:[#allocation4 + $0xa8] sm:$0xff]  ;;  %v67_v16 = vld [vmem:[#allocation4 + $0x20] sm:$0xff] }
  0x3a   :  { %398 = vmatpush3.bf16.msra.mxu0 %v397_v8  ;;  %v401_v14 = vpack.c.bf16 %v66_v11, %v65_v10  ;;  %v403_v15 = vpack.c.bf16 %v84_v13, %v83_v12  ;;  %v68_v17 = vld [vmem:[#allocation4 + $0x28] sm:$0xff]  ;;  %v85_v18 = vld [vmem:[#allocation4 + $0xb0] sm:$0xff]  ;;  %v86_v19 = vld [vmem:[#allocation4 + $0xb8] sm:$0xff]  ;;  %v540_v12 = vmov 0.0  }
  0x3b   :  { %400 = vmatprep.subr.bf16.mxu0 %v399_v9  ;;  %v405_v20 = vpack.c.bf16 %v68_v17, %v67_v16  ;;  %v407_v21 = vpack.c.bf16 %v86_v19, %v85_v18  ;;  %v69_v22 = vld [vmem:[#allocation4 + $0x30] sm:$0xff]  ;;  %v70_v23 = vld [vmem:[#allocation4 + $0x38] sm:$0xff]  ;;  %v87_v24 = vld [vmem:[#allocation4 + $0xc0] sm:$0xff]  ;;  %392 = vmatprep.mubr.msk.f32.mxu1 %vm539_vm0, %v540_v12 }
  0x3c   :  { %v88_v25 = vld [vmem:[#allocation4 + $0xc8] sm:$0xff]  ;;  %v62_v26 = vld [vmem:[#allocation2 + $0x8] sm:$0xff]  ;;  %v173_v27 = vld [vmem:[#allocation6] sm:$0xff]  ;;  %v409_v29 = vpack.c.bf16 %v70_v23, %v69_v22 }
  0x3d   :  { %166 = vmatprep.mubr.f32.mxu0 %v62_v26  ;;  %v174_v28 = vld [vmem:[#allocation6 + $0x8] sm:$0xff]  ;;  %v175_v31 = vld [vmem:[#allocation6 + $0x10] sm:$0xff]  ;;  %v176_v32 = vld [vmem:[#allocation6 + $0x18] sm:$0xff]  ;;  %v411_v33 = vpack.c.bf16 %v88_v25, %v87_v24 }
  0x3e   :  { %402 = vmatpush3.bf16.msra.mxu0 %v401_v14  ;;  %v428_v30 = vpack.c.bf16 %v174_v28, %v173_v27  ;;  %v71_v34 = vld [vmem:[#allocation4 + $0x40] sm:$0xff]  ;;  %v72_v35 = vld [vmem:[#allocation4 + $0x48] sm:$0xff]  ;;  %v89_v36 = vld [vmem:[#allocation4 + $0xd0] sm:$0xff]  ;;  %v431_v38 = vpack.c.bf16 %v176_v32, %v175_v31 }
  0x3f   :  { %404 = vmatprep.subr.bf16.mxu0 %v403_v15  ;;  %v90_v37 = vld [vmem:[#allocation4 + $0xd8] sm:$0xff]  ;;  %v177_v39 = vld [vmem:[#allocation6 + $0x20] sm:$0xff]  ;;  %v178_v40 = vld [vmem:[#allocation6 + $0x28] sm:$0xff]  ;;  %v413_v41 = vpack.c.bf16 %v72_v35, %v71_v34 }
  0x40   :  { %429 = vmatpush3.bf16.msra.mxu1 %v428_v30  ;;  %v415_v42 = vpack.c.bf16 %v90_v37, %v89_v36  ;;  %v73_v43 = vld [vmem:[#allocation4 + $0x50] sm:$0xff]  ;;  %v74_v44 = vld [vmem:[#allocation4 + $0x58] sm:$0xff]  ;;  %v91_v45 = vld [vmem:[#allocation4 + $0xe0] sm:$0xff]  ;;  %v434_v47 = vpack.c.bf16 %v178_v40, %v177_v39 }
  0x41   :  { %430 = vmatprep.subr.bf16.mxu1 %v538_v0  ;;  %v92_v46 = vld [vmem:[#allocation4 + $0xe8] sm:$0xff]  ;;  %v179_v48 = vld [vmem:[#allocation6 + $0x30] sm:$0xff]  ;;  %v180_v49 = vld [vmem:[#allocation6 + $0x38] sm:$0xff]  ;;  %v417_v50 = vpack.c.bf16 %v74_v44, %v73_v43 }
  0x42   :  { %406 = vmatpush3.bf16.msra.mxu0 %v405_v20  ;;  %v419_v51 = vpack.c.bf16 %v92_v46, %v91_v45  ;;  %v75_v52 = vld [vmem:[#allocation4 + $0x60] sm:$0xff]  ;;  %v76_v53 = vld [vmem:[#allocation4 + $0x68] sm:$0xff]  ;;  %v93_v54 = vld [vmem:[#allocation4 + $0xf0] sm:$0xff]  ;;  %v437_v56 = vpack.c.bf16 %v180_v49, %v179_v48 }
  0x43   :  { %408 = vmatprep.subr.bf16.mxu0 %v407_v21  ;;  %v94_v55 = vld [vmem:[#allocation4 + $0xf8] sm:$0xff]  ;;  %v181_v57 = vld [vmem:[#allocation6 + $0x40] sm:$0xff]  ;;  %v182_v58 = vld [vmem:[#allocation6 + $0x48] sm:$0xff]  ;;  %v421_v59 = vpack.c.bf16 %v76_v53, %v75_v52 }
  0x44   :  { %432 = vmatpush3.bf16.msra.mxu1 %v431_v38  ;;  %v423_v60 = vpack.c.bf16 %v94_v55, %v93_v54  ;;  %v77_v61 = vld [vmem:[#allocation4 + $0x70] sm:$0xff]  ;;  %v78_v62 = vld [vmem:[#allocation4 + $0x78] sm:$0xff]  ;;  %v440_v63 = vpack.c.bf16 %v182_v58, %v181_v57  ;;  %v185_v6 = vld [vmem:[#allocation6 + $0x60] sm:$0xff] }
  0x45   :  { %433 = vmatprep.subr.bf16.mxu1 %v538_v0  ;;  %v183_v1 = vld [vmem:[#allocation6 + $0x50] sm:$0xff]  ;;  %v184_v2 = vld [vmem:[#allocation6 + $0x58] sm:$0xff]  ;;  %v425_v3 = vpack.c.bf16 %v78_v62, %v77_v61  ;;  %v186_v7 = vld [vmem:[#allocation6 + $0x68] sm:$0xff] }
  0x46   :  { %410 = vmatpush3.bf16.msra.mxu0 %v409_v29  ;;  %v443_v4 = vpack.c.bf16 %v184_v2, %v183_v1  ;;  %v61_v5 = vld [vmem:[#allocation2] sm:$0xff]  ;;  %v446_v8 = vpack.c.bf16 %v186_v7, %v185_v6  ;;  %v188_v10 = vld [vmem:[#allocation6 + $0x78] sm:$0xff] }
  0x47   :  { %412 = vmatprep.subr.bf16.mxu0 %v411_v33  ;;  %v187_v9 = vld [vmem:[#allocation6 + $0x70] sm:$0xff] }
  0x48   :  { %435 = vmatpush3.bf16.msra.mxu1 %v434_v47  ;;  %v449_v11 = vpack.c.bf16 %v188_v10, %v187_v9  ;;  %v304_v14 = vld [vmem:[%s629_s2] ss:$0 sm:$0xff]  ;;  %v306_v40 = vld [vmem:[%s631_s4 + $0x1] ss:$0 sm:$0xff] }
  0x49   :  { %436 = vmatprep.subr.bf16.mxu1 %v538_v0  ;;  %v305_v38 = vld [vmem:[%s631_s4] ss:$0 sm:$0xff] }
  0x4a   :  { %414 = vmatpush3.bf16.msra.mxu0 %v413_v41 }
  0x4b   :  { %416 = vmatprep.subr.bf16.mxu0 %v415_v42 }
  0x4c   :  { %438 = vmatpush3.bf16.msra.mxu1 %v437_v56 }
  0x4d   :  { %439 = vmatprep.subr.bf16.mxu1 %v538_v0 }
  0x4e   :  { %418 = vmatpush3.bf16.msra.mxu0 %v417_v50 }
  0x4f   :  { %420 = vmatprep.subr.bf16.mxu0 %v419_v51 }
  0x50   :  { %441 = vmatpush3.bf16.msra.mxu1 %v440_v63 }
  0x51   :  { %442 = vmatprep.subr.bf16.mxu1 %v538_v0 }
  0x52   :  { %422 = vmatpush3.bf16.msra.mxu0 %v421_v59 }
  0x53   :  { %424 = vmatprep.subr.bf16.mxu0 %v423_v60 }
  0x54   :  { %444 = vmatpush3.bf16.msra.mxu1 %v443_v4 }
  0x55   :  { %445 = vmatprep.subr.bf16.mxu1 %v538_v0 }
  0x56   :  { %426 = vmatpush3.bf16.msra.mxu0 %v425_v3 }
  0x58   :  { %447 = vmatpush3.bf16.msra.mxu1 %v446_v8 }
  0x59   :  { %167 = vmatmul.mubr.f32.vlgmr.msra.gmra.mrb[0].mxu0 %v61_v5  ;;  %448 = vmatprep.subr.bf16.mxu1 %v538_v0 }
  0x5c   :  { %450 = vmatpush3.bf16.msra.mxu1 %v449_v11 }
 0x12c   :  { %v340_v13 = vpop.f32.mrb[0].mxu0 }
 0x12d   :  { %v341_v15 = vpop.f32.mrb[1].mxu0 }
 0x12e   :  { %v342_v16 = vadd.f32 %v341_v15, %v340_v13 }
 0x130   :  { %v169_v17 = vadd.f32 %v342_v16, %v304_v14 }
 0x132   :  { %v172_v18 = vmax.f32 %v169_v17, 0.0 }
 0x134   :  { %393 = vmatmul.mubr.f32.vlgmr.msra.gmra.mrb[0].mxu1 %v172_v18 }
 0x207   :  { %v255_v19 = vpop.f32.mrb[0].mxu1 }
 0x208   :  { %v259_v20 = vrot.slane %v255_v19, 4  ;;  %v394_v0 = vpop.f32.mrb[1].mxu1 }
 0x20a   :  { %v260_v21 = vadd.f32 %v259_v20, %v255_v19 }
 0x20c   :  { %v261_v22 = vrot.slane %v260_v21, 2 }
 0x20e   :  { %v262_v23 = vadd.f32 %v261_v22, %v260_v21 }
 0x210   :  { %v263_v24 = vrot.slane %v262_v23, 1 }
 0x212   :  { %v264_v25 = vadd.f32 %v263_v24, %v262_v23 }
 0x214   :  { %v265_v26 = vmul.f32 0.125, %v264_v25 }
 0x216   :  { %v266_v27 = vsub.f32 %v255_v19, %v265_v26 }
 0x218   :  { %v267_v28 = vmul.f32 %v266_v27, %v266_v27 }
 0x21a   :  { %v268_v29 = vrot.slane %v267_v28, 4 }
 0x21c   :  { %v269_v30 = vadd.f32 %v268_v29, %v267_v28 }
 0x21e   :  { %v270_v31 = vrot.slane %v269_v30, 2 }
 0x220   :  { %v271_v32 = vadd.f32 %v270_v31, %v269_v30 }
 0x222   :  { %v272_v33 = vrot.slane %v271_v32, 1 }
 0x224   :  { %v273_v34 = vadd.f32 %v272_v33, %v271_v32 }
 0x226   :  { %v274_v35 = vmul.f32 0.125, %v273_v34 }
 0x228   :  { %v275_v36 = vadd.f32 1e-05, %v274_v35 }
 0x22a   :  { %459 = vrsqrt.f32 %v275_v36 }
 0x234   :  { %v460_v37 = vpop.eup %459 }
 0x235   :  { %v277_v39 = vmul.f32 %v460_v37, %v266_v27 }
 0x237   :  { %v284_v41 = vmul.f32 %v305_v38, %v277_v39 }
 0x239   :  { %v289_v42 = vadd.f32 %v306_v40, %v284_v41 }
 0x23b   :  { %v290_v43 = vmax.f32 %v289_v42, 0.0 }
 0x23d   :  { %291 = vst [vmem:[%s632_s5] sm:$0xff] %v290_v43 }
 0x23e   :  { %296 = vsyncpa [#allocation5], 1 }
 0x23f   :  { %297 = vsyncpa [#allocation7], 1 }
 0x240   :  { %298 = vsyncmov [#allocation3] }
 0x243   :  { %s299_s10 = vpop.sfrf %298 }
 0x244   :  { %p307_p10 = scmp.ne.s32.totalorder %s299_s10, 0 }
 0x246   :  { %303 = shalt.err (%p307_p10)  }

</bundles_post_ra>
